<compile_context>
chip_gen: v5e
topology: v5e:2x2
jax: 0.10.0
libtpu: 0.0.40
codegen_flags: <defaults>
</compile_context>

<pallas_src>
import functools

import jax
import jax.numpy as jnp
from jax.experimental import pallas as pl
from jax.experimental.pallas import tpu as pltpu  # noqa: F401  (TPU backend)


def gru_cell_kernel(x_ref, h_ref, wx_ref, uzr_ref, uh_ref, b_ref, out_ref,
                    *, hidden_dim):
    """Single fused GRU-cell step.

    x_ref   : (B, I)   activations, f32
    h_ref   : (B, H)   previous hidden state, f32
    wx_ref  : (I, 3H)  [Wz | Wr | Wh], pre-transposed, compute dtype (bf16/f32)
    uzr_ref : (H, 2H)  [Uz | Ur],      pre-transposed, compute dtype
    uh_ref  : (H, H)   Uh,             pre-transposed, compute dtype
    b_ref   : (1, 3H)  [bWz+bUz | bWr+bUr | bWh+bUh], f32
    out_ref : (B, H)   new hidden state, f32
    """
    H = hidden_dim
    x = x_ref[...]
    h = h_ref[...]
    cd = wx_ref.dtype  # MXU compute dtype (bf16 on v6e/v7x path, f32 otherwise)

    # 3 fused MXU matmuls instead of 6, f32 accumulation.
    xw = jnp.dot(x.astype(cd), wx_ref[...],
                 preferred_element_type=jnp.float32)          # (B, 3H)
    hu = jnp.dot(h.astype(cd), uzr_ref[...],
                 preferred_element_type=jnp.float32)          # (B, 2H)

    pre = xw + b_ref[...]                                     # biases pre-added per gate

    # z and r gates in one fused (B, 2H) sigmoid, then static lane slices.
    zr = jax.nn.sigmoid(pre[:, : 2 * H] + hu)
    z_t = zr[:, :H]
    r_t = zr[:, H: 2 * H]

    # h_tilde = tanh(Wh x + bWh + Uh (r*h) + bUh)
    h_pre = pre[:, 2 * H:] + jnp.dot((r_t * h).astype(cd), uh_ref[...],
                                     preferred_element_type=jnp.float32)
    h_tilde = jnp.tanh(h_pre)

    # (1-z)*h + z*h~  ==  h + z*(h~ - h)   (saves one VPU multiply)
    out_ref[...] = (h + z_t * (h_tilde - h)).astype(out_ref.dtype)


def _vmem_block(shape):
    # Whole-array block resident in VMEM; shape bound as a function argument
    # (fixes the previous late-binding lambda bug).
    return pl.BlockSpec(shape, lambda: (0,) * len(shape))


def gru_cell(x, hx, fused):
    """One GRU-cell step. `fused` comes from prepare_fused_params() (built once)."""
    B = x.shape[0]
    H = hx.shape[1]
    args = (x.astype(jnp.float32), hx.astype(jnp.float32),
            fused["Wx"], fused["Uzr"], fused["Uh"], fused["b"])

    return pl.pallas_call(
        functools.partial(gru_cell_kernel, hidden_dim=H),
        out_shape=jax.ShapeDtypeStruct((B, H), jnp.float32),
        grid=(),
        in_specs=[_vmem_block(a.shape) for a in args],
        out_specs=_vmem_block((B, H)),
    )(*args)


def prepare_fused_params(params, compute_dtype=jnp.bfloat16):
    """One-time glue (init-time, NOT per call): transpose torch-style (out,in)
    weights to (in,out), concatenate per-gate matrices, pre-add paired biases,
    cast weights to the MXU compute dtype."""
    def t(name):
        W, b = params[name]
        return W.T, b

    Wz, bWz = t("Wz"); Uz, bUz = t("Uz")
    Wr, bWr = t("Wr"); Ur, bUr = t("Ur")
    Wh, bWh = t("Wh"); Uh, bUh = t("Uh")

    Wx = jnp.concatenate([Wz, Wr, Wh], axis=1).astype(compute_dtype)   # (I, 3H)
    Uzr = jnp.concatenate([Uz, Ur], axis=1).astype(compute_dtype)      # (H, 2H)
    Uh_c = Uh.astype(compute_dtype)                                    # (H, H)
    b = jnp.concatenate([bWz + bUz, bWr + bUr, bWh + bUh]
                        ).reshape(1, -1).astype(jnp.float32)           # (1, 3H)
    return {"Wx": Wx, "Uzr": Uzr, "Uh": Uh_c, "b": b}


def init_params(key, input_size, hidden_dim):
    """Deterministic init mimicking nn.Linear (uniform +-1/sqrt(fan_in)),
    stored torch-style as W:(out,in), b:(out,)."""
    names_fanin = {
        "Wz": input_size, "Uz": hidden_dim,
        "Wr": input_size, "Ur": hidden_dim,
        "Wh": input_size, "Uh": hidden_dim,
    }
    params = {}
    for name, fan_in in names_fanin.items():
        key, kw, kb = jax.random.split(key, 3)
        bound = 1.0 / (fan_in ** 0.5)
        W = jax.random.uniform(kw, (hidden_dim, fan_in), jnp.float32, -bound, bound)
        b = jax.random.uniform(kb, (hidden_dim,), jnp.float32, -bound, bound)
        params[name] = (W, b)
    return params


def gru_cell_ref(x, hx, params, compute_dtype=jnp.float32):
    """Pure-JAX reference mirroring the torch forward exactly.  `compute_dtype`
    rounds the matmul operands the same way the kernel does, so the comparison
    measures kernel error rather than bf16 quantization error."""
    def rd(a):
        return a.astype(compute_dtype).astype(jnp.float32)

    def lin(name, v):
        W, b = params[name]
        return rd(v) @ rd(W).T + b

    z_t = jax.nn.sigmoid(lin("Wz", x) + lin("Uz", hx))
    r_t = jax.nn.sigmoid(lin("Wr", x) + lin("Ur", hx))
    h_tilde = jnp.tanh(lin("Wh", x) + lin("Uh", r_t * hx))
    return (1.0 - z_t) * hx + z_t * h_tilde


if __name__ == "__main__":
    key = jax.random.PRNGKey(0)
    B, INPUT_SIZE, HIDDEN_DIM = 8, 16, 32

    k_params, k_x, k_h = jax.random.split(key, 3)
    params = init_params(k_params, INPUT_SIZE, HIDDEN_DIM)
    x = jax.random.normal(k_x, (B, INPUT_SIZE), jnp.float32)
    hx = jax.random.normal(k_h, (B, HIDDEN_DIM), jnp.float32)

    # --- f32 path: bit-faithful to the original module, tight tolerance. ---
    fused_f32 = prepare_fused_params(params, jnp.float32)
    out_f32 = jax.block_until_ready(gru_cell(x, hx, fused_f32))
    ref_f32 = gru_cell_ref(x, hx, params, jnp.float32)
    assert out_f32.shape == (B, HIDDEN_DIM)
    assert jnp.allclose(out_f32, ref_f32, atol=1e-4, rtol=1e-4), "f32 mismatch vs reference"

    # --- bf16 weights/activations on the MXU (v6e/v7x perf path), f32 gate math. ---
    fused_bf16 = prepare_fused_params(params, jnp.bfloat16)
    out_bf16 = jax.block_until_ready(gru_cell(x, hx, fused_bf16))
    ref_bf16 = gru_cell_ref(x, hx, params, jnp.bfloat16)
    assert jnp.allclose(out_bf16, ref_bf16, atol=1e-2, rtol=1e-2), "bf16 mismatch vs reference"

    print("KERNEL_OK")
</pallas_src>

<mosaic_0001>
module attributes {stable_mosaic.version = 11 : i64} {
  func.func @gru_cell_kernel(%arg0: memref<8x16xf32, #tpu.memory_space<vmem>>, %arg1: memref<8x32xf32, #tpu.memory_space<vmem>>, %arg2: memref<16x96xf32, #tpu.memory_space<vmem>>, %arg3: memref<32x64xf32, #tpu.memory_space<vmem>>, %arg4: memref<32x32xf32, #tpu.memory_space<vmem>>, %arg5: memref<1x96xf32, #tpu.memory_space<vmem>>, %arg6: memref<8x32xf32, #tpu.memory_space<vmem>>) attributes {dimension_semantics = [], scalar_prefetch = 0 : i64, scratch_operands = 0 : i64, tpu.core_type = #tpu.core_type<tc>} {
    %c0 = arith.constant 0 : index
    %c0_0 = arith.constant 0 : index
    %0 = vector.load %arg0[%c0, %c0_0] : memref<8x16xf32, #tpu.memory_space<vmem>>, vector<8x16xf32>
    %c0_1 = arith.constant 0 : index
    %c0_2 = arith.constant 0 : index
    %1 = vector.load %arg1[%c0_1, %c0_2] : memref<8x32xf32, #tpu.memory_space<vmem>>, vector<8x32xf32>
    %c0_3 = arith.constant 0 : index
    %c0_4 = arith.constant 0 : index
    %2 = vector.load %arg2[%c0_3, %c0_4] : memref<16x96xf32, #tpu.memory_space<vmem>>, vector<16x96xf32>
    %cst = arith.constant dense<0.000000e+00> : vector<8x96xf32>
    %3 = tpu.matmul %0, %2, %cst {dimension_numbers = #tpu.dot_dimension_numbers<[1], [0], [0], [1], [0, 0, 1, 1], [], []>} : vector<8x16xf32>, vector<16x96xf32>, vector<8x96xf32> -> vector<8x96xf32>
    %c0_5 = arith.constant 0 : index
    %c0_6 = arith.constant 0 : index
    %4 = vector.load %arg3[%c0_5, %c0_6] : memref<32x64xf32, #tpu.memory_space<vmem>>, vector<32x64xf32>
    %cst_7 = arith.constant dense<0.000000e+00> : vector<8x64xf32>
    %5 = tpu.matmul %1, %4, %cst_7 {dimension_numbers = #tpu.dot_dimension_numbers<[1], [0], [0], [1], [0, 0, 1, 1], [], []>} : vector<8x32xf32>, vector<32x64xf32>, vector<8x64xf32> -> vector<8x64xf32>
    %c0_8 = arith.constant 0 : index
    %c0_9 = arith.constant 0 : index
    %6 = vector.load %arg5[%c0_8, %c0_9] : memref<1x96xf32, #tpu.memory_space<vmem>>, vector<1x96xf32>
    %7 = vector.broadcast %6 : vector<1x96xf32> to vector<8x96xf32>
    %8 = arith.addf %3, %7 : vector<8x96xf32>
    %9 = vector.extract_strided_slice %8 {offsets = [0, 0], sizes = [8, 64], strides = [1, 1]} : vector<8x96xf32> to vector<8x64xf32>
    %10 = arith.addf %9, %5 : vector<8x64xf32>
    %11 = arith.negf %10 : vector<8x64xf32>
    %12 = math.exp %11 : vector<8x64xf32>
    %cst_10 = arith.constant 1.000000e+00 : f32
    %13 = vector.broadcast %cst_10 : f32 to vector<8x64xf32>
    %14 = arith.addf %13, %12 : vector<8x64xf32>
    %15 = arith.divf %13, %14 : vector<8x64xf32>
    %16 = vector.extract_strided_slice %15 {offsets = [0, 0], sizes = [8, 32], strides = [1, 1]} : vector<8x64xf32> to vector<8x32xf32>
    %17 = vector.extract_strided_slice %15 {offsets = [0, 32], sizes = [8, 32], strides = [1, 1]} : vector<8x64xf32> to vector<8x32xf32>
    %18 = vector.extract_strided_slice %8 {offsets = [0, 64], sizes = [8, 32], strides = [1, 1]} : vector<8x96xf32> to vector<8x32xf32>
    %19 = arith.mulf %17, %1 : vector<8x32xf32>
    %c0_11 = arith.constant 0 : index
    %c0_12 = arith.constant 0 : index
    %20 = vector.load %arg4[%c0_11, %c0_12] : memref<32x32xf32, #tpu.memory_space<vmem>>, vector<32x32xf32>
    %cst_13 = arith.constant dense<0.000000e+00> : vector<8x32xf32>
    %21 = tpu.matmul %19, %20, %cst_13 {dimension_numbers = #tpu.dot_dimension_numbers<[1], [0], [0], [1], [0, 0, 1, 1], [], []>} : vector<8x32xf32>, vector<32x32xf32>, vector<8x32xf32> -> vector<8x32xf32>
    %22 = arith.addf %18, %21 : vector<8x32xf32>
    %23 = math.tanh %22 : vector<8x32xf32>
    %24 = arith.subf %23, %1 : vector<8x32xf32>
    %25 = arith.mulf %16, %24 : vector<8x32xf32>
    %26 = arith.addf %1, %25 : vector<8x32xf32>
    %c0_14 = arith.constant 0 : index
    %c0_15 = arith.constant 0 : index
    %27 = vector.load %arg6[%c0_14, %c0_15] : memref<8x32xf32, #tpu.memory_space<vmem>>, vector<8x32xf32>
    tpu.vector_store %arg6[%c0_14, %c0_15], %26 {strides = array<i32>} : memref<8x32xf32, #tpu.memory_space<vmem>>, vector<8x32xf32>,
    return
  }
}

</mosaic_0001>

<bundles_post_ra>
// kernel: tpu_custom_call.1
= control target key start
LH: loop header
LB: loop body
LE: loop exit
PB: predicated region body
PF: predicated region fallthrough
CT: control target
= control target key end

     0   :  { %11 = vsyncpa [#allocation3], 0  ;;  %s497_s0 = inlined_call_operand.hbm [shape: f32[8,16], index: 0, kind: input, shape index: {}]   ;;  %s498_s1 = inlined_call_operand.hbm [shape: f32[8,32], index: 1, kind: input, shape index: {}]   ;;  %s499_s2 = inlined_call_operand.hbm [shape: f32[16,96], index: 2, kind: input, shape index: {}]   ;;  %s500_s3 = inlined_call_operand.hbm [shape: f32[32,64], index: 3, kind: input, shape index: {}]   ;;  %s501_s4 = inlined_call_operand.hbm [shape: f32[32,32], index: 4, kind: input, shape index: {}]   ;;  %s502_s5 = inlined_call_operand.vmem [shape: f32[1,96], index: 5, kind: input, shape index: {}]   ;;  %s503_s6 = inlined_call_operand.hbm [shape: f32[8,32], index: 6, kind: output, shape index: {}]  }
   0x1   :  { %12 = vsyncpa [#allocation6], 0 }
   0x2   :  { %13 = vsyncpa [#allocation9], 0  ;;  %s31_s23 = sshll.u32 %s498_s1, 4  ;;  %s32_s23 = int_to_ptr.hbm [resolvable:$true] %s31_s23 }
   0x3   :  { %14 = vsyncpa [#allocation4], 0  ;;  %s421_s24 = smov [#allocation5]   ;;  %s54_s28 = sshll.u32 %s500_s3, 4  ;;  %s55_s28 = int_to_ptr.hbm [resolvable:$true] %s54_s28 }
   0x4   :  { %s33_s25 = sshll.u32 %s421_s24, 4  ;;  %s422_s29 = smov [#allocation8]   ;;  %s34_s25 = int_to_ptr.vmem [resolvable:$true] %s33_s25 }
   0x5   :  { %36 = dma.hbm_to_vmem [thread:$0]  %s32_s23, 128, %s34_s25, [#allocation6]  }
   0x6   :  { %s56_s30 = sshll.u32 %s422_s29, 4  ;;  %s20_s9 = sshll.u32 %s497_s0, 4  ;;  %s57_s30 = int_to_ptr.vmem [resolvable:$true] %s56_s30  ;;  %s21_s9 = int_to_ptr.hbm [resolvable:$true] %s20_s9 }
   0x7   :  { %s423_s1 = smov 128   ;;  %s424_s10 = smov 8  }
   0x8   :  { %62 = dma.hbm_to_vmem [thread:$0]  %s55_s28, 512, %s57_s30, [#allocation9], %s423_s1, %s423_s1, %s424_s10  }
   0x9   :  { %s41_s13 = sshll.u32 %s499_s2, 4  ;;  %s425_s14 = smov [#allocation2]   ;;  %s42_s13 = int_to_ptr.hbm [resolvable:$true] %s41_s13 }
   0xa   :  { %s22_s15 = sshll.u32 %s425_s14, 4  ;;  %s426_s3 = smov [#allocation7]   ;;  %s23_s15 = int_to_ptr.vmem [resolvable:$true] %s22_s15 }
   0xb   :  { %25 = dma.hbm_to_vmem [thread:$0]  %s21_s9, 128, %s23_s15, [#allocation3]  }
   0xc   :  { %s43_s16 = sshll.u32 %s426_s3, 4  ;;  %s67_s0 = sshll.u32 %s501_s4, 4  ;;  %s44_s16 = int_to_ptr.vmem [resolvable:$true] %s43_s16  ;;  %s68_s0 = int_to_ptr.hbm [resolvable:$true] %s67_s0 }
   0xd   :  { %49 = dma.hbm_to_vmem [thread:$0]  %s42_s13, 256, %s44_s16, [#allocation6], %s423_s1, %s423_s1, %s424_s10  }
   0xe   :  { %s427_s19 = smov [#allocation10]  }
   0xf   :  { %s69_s20 = sshll.u32 %s427_s19, 4  ;;  %s70_s20 = int_to_ptr.vmem [resolvable:$true] %s69_s20 }
  0x10   :  { %75 = dma.hbm_to_vmem [thread:$0]  %s68_s0, 512, %s70_s20, [#allocation9], %s423_s1, %s423_s1, %s424_s10  }
  0x11   :  { %413 = dma.done.wait [#allocation3], 128  }
  0x12   :  { %414 = vsyncadd [#allocation3], 4294967168 }
  0x13   :  { %415 = dma.done.wait [#allocation6], 384  }
  0x14   :  { %416 = vsyncadd [#allocation6], 4294966912 }
  0x15   :  { %417 = dma.done.wait [#allocation9], 1024  }
  0x16   :  { %418 = vsyncadd [#allocation9], 4294966272  ;;  %v105_v0 = vld [vmem:[#allocation8 + $0x18] sm:$0xff]  ;;  %v104_v1 = vld [vmem:[#allocation8 + $0x10] sm:$0xff]  ;;  %vm134_vm0 = vcmask 130048   ;;  %s428_s2 = smov 32  }
  0x17   :  { %v101_v2 = vld [vmem:[#allocation7 + $0x8] sm:$0xff]  ;;  %122 = vmatpush.msra.mxu0 %v105_v0  ;;  %v100_v3 = vld [vmem:[#allocation7] sm:$0xff]  ;;  %v98_v4 = vld [vmem:[#allocation2] sm:$0xff]  ;;  %vm106_vm1 = vcmask 261120   ;;  %s430_s22 = smov 64   ;;  %s431_s23 = smov [#allocation11]  }
  0x18   :  { %152 = vmatpush.msra.mxu1 %v101_v2  ;;  %v103_v5 = vld [vmem:[#allocation8 + $0x8] sm:$0xff]  ;;  %v102_v7 = vld [vmem:[#allocation8] sm:$0xff]  ;;  %v185_v13 = vld [vmem:[#allocation10 + $0x18] sm:$0xff]  ;;  %s233_s24 = sshll.u32 %s431_s23, 4  ;;  %s235_s27 = sshll.u32 %s503_s6, 4  ;;  %s234_s24 = int_to_ptr.vmem [resolvable:$true] %s233_s24  ;;  %s236_s27 = int_to_ptr.hbm [resolvable:$true] %s235_s27 }
  0x19   :  { %123 = vmatpush.msra.mxu0 %v104_v1  ;;  %v482_v6 = vld [vmem:[#allocation5] sm:$0xff]  ;;  %v262_v8 = vld [vmem:[%s502_s5] ss:$0 sm:$0xff]  ;;  %v184_v14 = vld [vmem:[#allocation10 + $0x10] sm:$0xff]  ;;  %203 = vmatpush.msra.mxu2 %v185_v13  ;;  %s429_s5 = smov 96  }
  0x1a   :  { %153 = vmatpush.msra.mxu1 %v100_v3  ;;  %178 = vrot.lane.b32.xlu0 %v482_v6, %s428_s2  ;;  %v183_v16 = vld [vmem:[#allocation10 + $0x8] sm:$0xff]  ;;  %v182_v17 = vld [vmem:[#allocation10] sm:$0xff] }
  0x1b   :  { %248 = vmatmul.msk.f32.vlgmr.msra.gmra.mxu1 %vm134_vm0, %v98_v4  ;;  %124 = vmatpush.msra.mxu0 %v103_v5 }
  0x1c   :  { %204 = vmatpush.msra.mxu2 %v184_v14 }
  0x1d   :  { %125 = vmatpush.msra.mxu0 %v102_v7 }
  0x1e   :  { %247 = vmatmul.msk.f32.vlgmr.msra.gmra.mxu0 %vm106_vm1, %v482_v6  ;;  %205 = vmatpush.msra.mxu2 %v183_v16 }
  0x20   :  { %206 = vmatpush.msra.mxu2 %v182_v17 }
  0x8c   :  { %v179_v27 = vpop.permute.xlu0 %178 }
  0x98   :  { %v155_v9 = vpop.f32.mrf.mxu1 }
  0x99   :  { %v156_v10 = vadd.f32 %v262_v8, %v155_v9 }
  0x9b   :  { %v127_v11 = vpop.f32.mrf.mxu0 }
  0x9c   :  { %v158_v12 = vadd.f32 %v156_v10, %v127_v11 }
  0x9e   :  { %v249_v15 = vmul.f32 -1.442695, %v158_v12 }
  0xa0   :  { %263 = vpow2.f32 %v249_v15 }
  0xa6   :  { %v264_v18 = vpop.eup %263 }
  0xa7   :  { %v162_v19 = vadd.f32 1.0, %v264_v18 }
  0xa9   :  { %265 = vrcp.f32 %v162_v19  ;;  %v174_v23 = vand.u32 2147483648, %v162_v19  ;;  %v172_v25 = vand.u32 2147483647, %v162_v19  ;;  %vm168_vm3 = vweird.f32 %v162_v19 }
  0xab   :  { %v175_v28 = vor.u32 1.1754944e-38, %v174_v23  ;;  %vm173_vm5 = vcmp.eq.f32.partialorder %v172_v25, 8.507059e+37 }
  0xaf   :  { %v266_v20 = vpop.eup %265 }
  0xb0   :  { %v164_v21 = vmul.f32 %v266_v20, %v162_v19  ;;  %vm169_vm2 = vweird.f32 %v266_v20 }
  0xb1   :  { %vm170_vm4 = vmor %vm168_vm3, %vm169_vm2 }
  0xb2   :  { %v165_v22 = vsub.f32 1.0, %v164_v21 }
  0xb4   :  { %v166_v24 = vmul.f32 %v266_v20, %v165_v22 }
  0xb6   :  { %v167_v26 = vadd.f32 %v266_v20, %v166_v24 }
  0xb8   :  { %v171_v29 = vsel %vm170_vm4, %v266_v20, %v167_v26 }
  0xb9   :  { %v176_v30 = vsel %vm173_vm5, %v175_v28, %v171_v29 }
  0xba   :  { %v181_v31 = vmul.f32 %v179_v27, %v176_v30 }
  0xbc   :  { %187 = vrot.lane.b32.xlu0 %v181_v31, %s429_s5 }
 0x12e   :  { %v188_v32 = vpop.permute.xlu0 %187 }
 0x12f   :  { %250 = vmatmul.msk.f32.vlgmr.msra.gmra.mxu2 %vm106_vm1, %v188_v32 }
 0x1b2   :  { %v208_v33 = vpop.f32.mrf.mxu2 }
 0x1b3   :  { %212 = vrot.lane.b32.xlu1 %v208_v33, %s430_s22 }
 0x1bb   :  { %217 = vrot.lane.b32.xlu1 %v482_v6, %s430_s22 }
 0x225   :  { %v213_v34 = vpop.permute.xlu1 %212 }
 0x226   :  { %v215_v35 = vadd.f32 %v213_v34, %v156_v10 }
 0x228   :  { %267 = vtanh.f32 %v215_v35 }
 0x22d   :  { %v218_v36 = vpop.permute.xlu1 %217 }
 0x22e   :  { %v268_v37 = vpop.eup %267 }
 0x22f   :  { %v220_v38 = vsub.f32 %v268_v37, %v218_v36 }
 0x231   :  { %222 = vrot.lane.b32.xlu2 %v220_v38, %s430_s22 }
 0x28b   :  { %v223_v39 = vpop.permute.xlu2 %222 }
 0x28c   :  { %v225_v40 = vmul.f32 %v223_v39, %v176_v30 }
 0x28e   :  { %v226_v41 = vadd.f32 %v225_v40, %v482_v6 }
 0x290   :  { %227 = vst.msk [vmem:[#allocation11] sm:$0xff] %vm106_vm1, %v226_v41 }
 0x291   :  { %238 = dma.vmem_to_hbm [thread:$0]  %s234_s24, 128, %s236_s27, [#allocation4]  }
 0x292   :  { %419 = dma.done.wait [#allocation4], 128  }
 0x293   :  { %420 = vsyncadd [#allocation4], 4294967168 }
 0x294   :  { %243 = vsyncpa [#allocation3], 1 }
 0x295   :  { %244 = vsyncpa [#allocation6], 1 }
 0x296   :  { %245 = vsyncpa [#allocation9], 1 }
 0x297   :  { %246 = vsyncpa [#allocation4], 1 }

</bundles_post_ra>
